<compile_context>
chip_gen: v6e
topology: v6e:2x2x1
jax: 0.10.0
libtpu: 0.0.40
codegen_flags: <defaults>
</compile_context>

<pallas_src>
import jax
import jax.numpy as jnp
from jax.experimental import pallas as pl
from jax.experimental.pallas import tpu as pltpu


# ---------------------------------------------------------------------------
# Kernels
# ---------------------------------------------------------------------------
def _fused_kernel(x_ref, o_ref):
    """Single-pass SIAM2D: reductions + tiny scramble + gating on one tile."""
    x = x_ref[...].astype(jnp.float32)                       # (bt, C, H, W)
    bt, C, H, W = x.shape

    z = jnp.mean(x, axis=1, keepdims=True)                   # (bt, 1, H, W)
    a_col = jnp.mean(z, axis=2, keepdims=True)               # (bt, 1, 1, W)
    a_row = jnp.mean(z, axis=3, keepdims=True)               # (bt, 1, H, 1)

    # NOTE: normalizations intentionally "swapped" (1/H with the W-sum and
    # 1/W with the H-sum) -- faithful to the PyTorch module.
    t = jnp.clip(jnp.sum(x * a_col, axis=3) * (1.0 / H), 0.0, 1.0)   # (bt, C, H)
    s = jnp.clip(jnp.sum(x * a_row, axis=2) * (1.0 / W), 0.0, 1.0)   # (bt, C, W)

    # PyTorch "scramble": m[b, c2, n2] = t[b, k % C, k // C] with k = c2*N+n2,
    # i.e. transpose-then-row-major-reshape of the tiny (C, N) intermediate
    # (a few KB per batch; clamp commutes with this permutation).
    m_col = jnp.swapaxes(t, 1, 2).reshape(bt, C, H)
    m_row = jnp.swapaxes(s, 1, 2).reshape(bt, C, W)

    gate = m_col[:, :, :, None] + m_row[:, :, None, :]       # (bt, C, H, W)
    o_ref[...] = (gate * x).astype(o_ref.dtype)


def _reduce_kernel(x_ref, t_ref, s_ref):
    """Fallback pass 1: x -> tiny clamped reduction vectors (unscrambled)."""
    x = x_ref[...].astype(jnp.float32)                       # (bt, C, H, W)
    H = x.shape[2]
    W = x.shape[3]
    z = jnp.mean(x, axis=1, keepdims=True)                   # (bt, 1, H, W)
    a_col = jnp.mean(z, axis=2, keepdims=True)               # (bt, 1, 1, W)
    a_row = jnp.mean(z, axis=3, keepdims=True)               # (bt, 1, H, 1)
    t = jnp.sum(x * a_col, axis=3, keepdims=True) * (1.0 / H)  # (bt, C, H, 1)
    s = jnp.sum(x * a_row, axis=2, keepdims=True) * (1.0 / W)  # (bt, C, 1, W)
    t_ref[...] = jnp.clip(t, 0.0, 1.0)
    s_ref[...] = jnp.clip(s, 0.0, 1.0)


def _apply_kernel(x_ref, mc_ref, mr_ref, o_ref):
    """Fallback pass 2: broadcast gate (m_col + m_row) * x, elementwise."""
    gate = mc_ref[...] + mr_ref[...]                          # -> (bt, ct, H, W)
    o_ref[...] = (gate * x_ref[...].astype(jnp.float32)).astype(o_ref.dtype)


# ---------------------------------------------------------------------------
# Block / VMEM sizing helpers
# ---------------------------------------------------------------------------
_VMEM_BUDGET = 36 << 20      # working-set budget used when picking blocks
_VMEM_LIMIT_MIN = 32 << 20   # never tighter than any chip's default scoped VMEM
_VMEM_LIMIT_MAX = 48 << 20   # stay well inside v7x's 64 MiB physical VMEM


def _round_up(v, m):
    return -(-v // m) * m


def _pick_block(n, unit_bytes, unit_ws_bytes, budget_bytes,
                target_bytes=4 << 20, min_block_bytes=512 << 10, min_steps=4):
    """Pick a divisor of n for one grid axis.

    * d * unit_ws_bytes (real VMEM working set) must fit `budget_bytes`.
    * d * unit_bytes (the x-sized block) is kept <= ~`target_bytes` (4 MiB
      amortizes the ~0.35 us per-grid-step overhead even at 3.2 TB/s HBM).
    * If possible without dropping the block below `min_block_bytes`
      (~512 KiB, the measured v5e/v6e roofline knee), keep >= `min_steps`
      grid steps so both v7x TensorCores get >= 2 steps each.
    """
    divs = [d for d in range(1, n + 1) if n % d == 0]
    fit = [d for d in divs if d * unit_ws_bytes <= budget_bytes]
    if not fit:
        return 1
    capped = [d for d in fit if d * unit_bytes <= target_bytes] or [fit[0]]
    best = capped[-1]
    stepped = [d for d in capped
               if n // d >= min_steps and d * unit_bytes >= min_block_bytes]
    if stepped:
        best = stepped[-1]
    return best


def _compiler_params(dims, ws_bytes):
    limit = int(min(_VMEM_LIMIT_MAX, max(_VMEM_LIMIT_MIN, 2 * ws_bytes)))
    return pltpu.CompilerParams(dimension_semantics=dims,
                                vmem_limit_bytes=limit)


# ---------------------------------------------------------------------------
# Wrappers
# ---------------------------------------------------------------------------
def _siam2d_fused(x):
    """Fused single-pass SIAM2D: 1 read + 1 write of x."""
    B, C, H, W = x.shape
    slab = C * H * W * x.dtype.itemsize
    slab_f32 = C * H * W * 4
    # in + out blocks, double-buffered, plus ~4 x-sized f32 temporaries.
    unit_ws = 4 * slab + 4 * slab_f32
    bt = _pick_block(B, slab, unit_ws, _VMEM_BUDGET)
    spec = pl.BlockSpec((bt, C, H, W), lambda b: (b, 0, 0, 0))
    return pl.pallas_call(
        _fused_kernel,
        out_shape=jax.ShapeDtypeStruct((B, C, H, W), x.dtype),
        grid=(B // bt,),
        in_specs=[spec],
        out_specs=spec,
        compiler_params=_compiler_params(("parallel",), bt * unit_ws),
    )(x)


def _siam2d_two_pass(x):
    """Proven fallback: 2 reads + 1 write of x; scramble in the wrapper."""
    B, C, H, W = x.shape
    itemsize = x.dtype.itemsize
    slab = C * H * W * itemsize
    slab_f32 = C * H * W * 4

    # ---- pass 1: x -> tiny clamped reduction vectors -----------------------
    # (bt,C,H,1)/(bt,C,1,W) output blocks are lane/sublane padded in VMEM;
    # include that in the working-set estimate (review item).
    pad_t = C * _round_up(H, 8) * 128 * 4
    pad_s = C * 8 * _round_up(W, 128) * 4
    ws1 = 2 * slab + 3 * slab_f32 + 4 * (pad_t + pad_s)
    bt1 = _pick_block(B, slab, ws1, _VMEM_BUDGET)
    x1_spec = pl.BlockSpec((bt1, C, H, W), lambda b: (b, 0, 0, 0))
    t, s = pl.pallas_call(
        _reduce_kernel,
        out_shape=(jax.ShapeDtypeStruct((B, C, H, 1), jnp.float32),
                   jax.ShapeDtypeStruct((B, C, 1, W), jnp.float32)),
        grid=(B // bt1,),
        in_specs=[x1_spec],
        out_specs=(pl.BlockSpec((bt1, C, H, 1), lambda b: (b, 0, 0, 0)),
                   pl.BlockSpec((bt1, C, 1, W), lambda b: (b, 0, 0, 0))),
        compiler_params=_compiler_params(("parallel",), bt1 * ws1),
    )(x)

    # Wrapper-side scramble on the tiny (KB-scale) intermediates:
    #   m_col[b, c2, h2] = t[b, k % C, k // C],  k = c2*H + h2   (same for W).
    m_col = jnp.transpose(t[..., 0], (0, 2, 1)).reshape(B, C, H)[..., None]
    m_row = jnp.transpose(s[:, :, 0, :], (0, 2, 1)).reshape(B, C, W)[:, :, None, :]

    # ---- pass 2: gated output, tiled over (batch, channel) -----------------
    unit_c_bytes = H * W * itemsize
    unit_c_ws = 4 * unit_c_bytes + 2 * H * W * 4
    ct = _pick_block(C, unit_c_bytes, unit_c_ws, _VMEM_BUDGET)
    bt2 = _pick_block(B, ct * unit_c_bytes, ct * unit_c_ws, _VMEM_BUDGET)
    x2_spec = pl.BlockSpec((bt2, ct, H, W), lambda b, c: (b, c, 0, 0))
    return pl.pallas_call(
        _apply_kernel,
        out_shape=jax.ShapeDtypeStruct((B, C, H, W), x.dtype),
        grid=(B // bt2, C // ct),
        in_specs=[x2_spec,
                  pl.BlockSpec((bt2, ct, H, 1), lambda b, c: (b, c, 0, 0)),
                  pl.BlockSpec((bt2, ct, 1, W), lambda b, c: (b, c, 0, 0))],
        out_specs=x2_spec,
        compiler_params=_compiler_params(("parallel", "parallel"),
                                         bt2 * ct * unit_c_ws),
    )(x, m_col, m_row)


_FUSED_SUPPORTED = {}   # (shape, dtype) -> whether the fused path lowered


def siam2d(x):
    """SIAM2D forward. x: (B, C, H, W).

    Tries the fused single-pass kernel first; if Mosaic cannot lower the tiny
    in-kernel reshape for this shape, falls back to the validated two-pass
    kernel.  (Call un-jitted at least once per shape so the fallback can
    engage; `_siam2d_two_pass` is always safe to call directly.)
    """
    key = (tuple(x.shape), str(x.dtype))
    if _FUSED_SUPPORTED.get(key, True):
        try:
            out = _siam2d_fused(x)
            _FUSED_SUPPORTED[key] = True
            return out
        except Exception:
            _FUSED_SUPPORTED[key] = False
    return _siam2d_two_pass(x)


def siam2d_ref(x):
    """Pure-JAX transcription of the PyTorch forward (for verification)."""
    b, c, h, w = x.shape
    z = jnp.mean(x, axis=1)                                  # (b, h, w)
    a_col = jnp.mean(z, axis=1, keepdims=True)               # (b, 1, w)
    a_row = jnp.mean(z, axis=2, keepdims=True)               # (b, h, 1)
    f_col = jnp.transpose(x, (0, 2, 1, 3)).reshape(b, h * c, w)
    f_row = jnp.transpose(x, (0, 3, 1, 2)).reshape(b, w * c, h)
    a_col_t = jnp.transpose(a_col, (0, 2, 1))                # (b, w, 1)
    m_col = jnp.matmul(f_col, a_col_t) / h                   # (b, h*c, 1)
    m_row = jnp.matmul(f_row, a_row) / w                     # (b, w*c, 1)
    m_col = jnp.clip(m_col.reshape(b, c, h, 1), 0.0, 1.0)
    m_row = jnp.clip(m_row.reshape(b, c, 1, w), 0.0, 1.0)
    return (m_col + m_row) * x


if __name__ == "__main__":
    # SIAM2D has no learnable parameters (ReLU1/Hardtanh is parameter-free).
    key = jax.random.PRNGKey(0)
    B, C, H, W = 2, 4, 16, 16
    x = jax.random.normal(key, (B, C, H, W), dtype=jnp.float32)

    out = jax.block_until_ready(siam2d(x))
    ref = siam2d_ref(x)
    assert out.shape == (B, C, H, W), out.shape
    assert jnp.allclose(out, ref, rtol=1e-5, atol=1e-5), float(
        jnp.max(jnp.abs(out - ref)))

    # Non-square sanity check (H != W, C does not divide H or W) -- exercises
    # the exact row-major order of the scramble permutation.
    x2 = jax.random.normal(jax.random.PRNGKey(1), (2, 3, 8, 16), dtype=jnp.float32)
    out2 = jax.block_until_ready(siam2d(x2))
    ref2 = siam2d_ref(x2)
    assert jnp.allclose(out2, ref2, rtol=1e-5, atol=1e-5), float(
        jnp.max(jnp.abs(out2 - ref2)))

    # Explicitly verify the safe two-pass fallback path as well.
    out3 = jax.block_until_ready(_siam2d_two_pass(x))
    assert jnp.allclose(out3, ref, rtol=1e-5, atol=1e-5), float(
        jnp.max(jnp.abs(out3 - ref)))

    print("KERNEL_OK")
</pallas_src>

<mosaic_0001>
module attributes {stable_mosaic.version = 11 : i64} {
  func.func @_fused_kernel(%arg0: i32, %arg1: memref<2x4x16x16xf32, #tpu.memory_space<vmem>>, %arg2: memref<2x4x16x16xf32, #tpu.memory_space<vmem>>) attributes {dimension_semantics = [#tpu.dimension_semantics<parallel>], iteration_bounds = array<i64: 1>, scalar_prefetch = 0 : i64, scratch_operands = 0 : i64, tpu.core_type = #tpu.core_type<tc>, window_params = [{transform_indices = @transform_0, window_bounds = array<i64: 2, 4, 16, 16>}, {transform_indices = @transform_1, window_bounds = array<i64: 2, 4, 16, 16>}]} {
    %c0 = arith.constant 0 : index
    %c0_0 = arith.constant 0 : index
    %c0_1 = arith.constant 0 : index
    %c0_2 = arith.constant 0 : index
    %0 = vector.load %arg1[%c0, %c0_0, %c0_1, %c0_2] : memref<2x4x16x16xf32, #tpu.memory_space<vmem>>, vector<2x4x16x16xf32>
    %cst = arith.constant dense<0.000000e+00> : vector<2x16x16xf32>
    %1 = vector.multi_reduction <add>, %0, %cst [1] : vector<2x4x16x16xf32> to vector<2x16x16xf32>
    %2 = vector.shape_cast %1 : vector<2x16x16xf32> to vector<2x1x16x16xf32>
    %cst_3 = arith.constant 4.000000e+00 : f32
    %3 = vector.broadcast %cst_3 : f32 to vector<2x1x16x16xf32>
    %4 = arith.divf %2, %3 : vector<2x1x16x16xf32>
    %cst_4 = arith.constant dense<0.000000e+00> : vector<2x1x16xf32>
    %5 = vector.multi_reduction <add>, %4, %cst_4 [2] : vector<2x1x16x16xf32> to vector<2x1x16xf32>
    %6 = vector.shape_cast %5 : vector<2x1x16xf32> to vector<2x1x1x16xf32>
    %cst_5 = arith.constant 1.600000e+01 : f32
    %7 = vector.broadcast %cst_5 : f32 to vector<2x1x1x16xf32>
    %8 = arith.divf %6, %7 : vector<2x1x1x16xf32>
    %cst_6 = arith.constant dense<0.000000e+00> : vector<2x1x16xf32>
    %9 = vector.multi_reduction <add>, %4, %cst_6 [3] : vector<2x1x16x16xf32> to vector<2x1x16xf32>
    %10 = vector.shape_cast %9 : vector<2x1x16xf32> to vector<2x1x16x1xf32>
    %cst_7 = arith.constant 1.600000e+01 : f32
    %11 = vector.broadcast %cst_7 : f32 to vector<2x1x16x1xf32>
    %12 = arith.divf %10, %11 : vector<2x1x16x1xf32>
    %13 = vector.broadcast %8 : vector<2x1x1x16xf32> to vector<2x4x16x16xf32>
    %14 = arith.mulf %0, %13 : vector<2x4x16x16xf32>
    %cst_8 = arith.constant dense<0.000000e+00> : vector<2x4x16xf32>
    %15 = vector.multi_reduction <add>, %14, %cst_8 [3] : vector<2x4x16x16xf32> to vector<2x4x16xf32>
    %cst_9 = arith.constant 6.250000e-02 : f32
    %16 = vector.broadcast %cst_9 : f32 to vector<2x4x16xf32>
    %17 = arith.mulf %15, %16 : vector<2x4x16xf32>
    %cst_10 = arith.constant 0.000000e+00 : f32
    %cst_11 = arith.constant 1.000000e+00 : f32
    %18 = vector.broadcast %cst_10 : f32 to vector<2x4x16xf32>
    %19 = arith.maximumf %18, %17 : vector<2x4x16xf32>
    %20 = vector.broadcast %cst_11 : f32 to vector<2x4x16xf32>
    %21 = arith.minimumf %20, %19 : vector<2x4x16xf32>
    %22 = vector.broadcast %12 : vector<2x1x16x1xf32> to vector<2x4x16x16xf32>
    %23 = arith.mulf %0, %22 : vector<2x4x16x16xf32>
    %cst_12 = arith.constant dense<0.000000e+00> : vector<2x4x16xf32>
    %24 = vector.multi_reduction <add>, %23, %cst_12 [2] : vector<2x4x16x16xf32> to vector<2x4x16xf32>
    %cst_13 = arith.constant 6.250000e-02 : f32
    %25 = vector.broadcast %cst_13 : f32 to vector<2x4x16xf32>
    %26 = arith.mulf %24, %25 : vector<2x4x16xf32>
    %cst_14 = arith.constant 0.000000e+00 : f32
    %cst_15 = arith.constant 1.000000e+00 : f32
    %27 = vector.broadcast %cst_14 : f32 to vector<2x4x16xf32>
    %28 = arith.maximumf %27, %26 : vector<2x4x16xf32>
    %29 = vector.broadcast %cst_15 : f32 to vector<2x4x16xf32>
    %30 = arith.minimumf %29, %28 : vector<2x4x16xf32>
    %31 = tpu.transpose %21, [0, 2, 1] : vector<2x4x16xf32> -> vector<2x16x4xf32>
    %32 = vector.shape_cast %31 : vector<2x16x4xf32> to vector<2x4x16xf32>
    %33 = tpu.transpose %30, [0, 2, 1] : vector<2x4x16xf32> -> vector<2x16x4xf32>
    %34 = vector.shape_cast %33 : vector<2x16x4xf32> to vector<2x4x16xf32>
    %35 = vector.shape_cast %32 : vector<2x4x16xf32> to vector<2x4x16x1xf32>
    %36 = vector.shape_cast %34 : vector<2x4x16xf32> to vector<2x4x1x16xf32>
    %37 = vector.broadcast %35 : vector<2x4x16x1xf32> to vector<2x4x16x16xf32>
    %38 = vector.broadcast %36 : vector<2x4x1x16xf32> to vector<2x4x16x16xf32>
    %39 = arith.addf %37, %38 : vector<2x4x16x16xf32>
    %40 = arith.mulf %39, %0 : vector<2x4x16x16xf32>
    %c0_16 = arith.constant 0 : index
    %c0_17 = arith.constant 0 : index
    %c0_18 = arith.constant 0 : index
    %c0_19 = arith.constant 0 : index
    %41 = vector.load %arg2[%c0_16, %c0_17, %c0_18, %c0_19] : memref<2x4x16x16xf32, #tpu.memory_space<vmem>>, vector<2x4x16x16xf32>
    tpu.vector_store %arg2[%c0_16, %c0_17, %c0_18, %c0_19], %40 {strides = array<i32>} : memref<2x4x16x16xf32, #tpu.memory_space<vmem>>, vector<2x4x16x16xf32>,
    return
  }
  func.func @transform_0(%arg0: i32) -> (i32, i32, i32, i32) {
    %c0_i32 = arith.constant 0 : i32
    %c0_i32_0 = arith.constant 0 : i32
    %c0_i32_1 = arith.constant 0 : i32
    %c0_i32_2 = arith.constant 0 : i32
    return %arg0, %c0_i32, %c0_i32_0, %c0_i32_1 : i32, i32, i32, i32
  }
  func.func @transform_1(%arg0: i32) -> (i32, i32, i32, i32) {
    %c0_i32 = arith.constant 0 : i32
    %c0_i32_0 = arith.constant 0 : i32
    %c0_i32_1 = arith.constant 0 : i32
    %c0_i32_2 = arith.constant 0 : i32
    return %arg0, %c0_i32, %c0_i32_0, %c0_i32_1 : i32, i32, i32, i32
  }
}

module attributes {stable_mosaic.version = 11 : i64} {
  func.func @_reduce_kernel(%arg0: i32, %arg1: memref<2x4x16x16xf32, #tpu.memory_space<vmem>>, %arg2: memref<2x4x16x1xf32, #tpu.memory_space<vmem>>, %arg3: memref<2x4x1x16xf32, #tpu.memory_space<vmem>>) attributes {dimension_semantics = [#tpu.dimension_semantics<parallel>], iteration_bounds = array<i64: 1>, scalar_prefetch = 0 : i64, scratch_operands = 0 : i64, tpu.core_type = #tpu.core_type<tc>, window_params = [{transform_indices = @transform_0, window_bounds = array<i64: 2, 4, 16, 16>}, {transform_indices = @transform_1, window_bounds = array<i64: 2, 4, 16, 1>}, {transform_indices = @transform_2, window_bounds = array<i64: 2, 4, 1, 16>}]} {
    %c0 = arith.constant 0 : index
    %c0_0 = arith.constant 0 : index
    %c0_1 = arith.constant 0 : index
    %c0_2 = arith.constant 0 : index
    %0 = vector.load %arg1[%c0, %c0_0, %c0_1, %c0_2] : memref<2x4x16x16xf32, #tpu.memory_space<vmem>>, vector<2x4x16x16xf32>
    %cst = arith.constant dense<0.000000e+00> : vector<2x16x16xf32>
    %1 = vector.multi_reduction <add>, %0, %cst [1] : vector<2x4x16x16xf32> to vector<2x16x16xf32>
    %2 = vector.shape_cast %1 : vector<2x16x16xf32> to vector<2x1x16x16xf32>
    %cst_3 = arith.constant 4.000000e+00 : f32
    %3 = vector.broadcast %cst_3 : f32 to vector<2x1x16x16xf32>
    %4 = arith.divf %2, %3 : vector<2x1x16x16xf32>
    %cst_4 = arith.constant dense<0.000000e+00> : vector<2x1x16xf32>
    %5 = vector.multi_reduction <add>, %4, %cst_4 [2] : vector<2x1x16x16xf32> to vector<2x1x16xf32>
    %6 = vector.shape_cast %5 : vector<2x1x16xf32> to vector<2x1x1x16xf32>
    %cst_5 = arith.constant 1.600000e+01 : f32
    %7 = vector.broadcast %cst_5 : f32 to vector<2x1x1x16xf32>
    %8 = arith.divf %6, %7 : vector<2x1x1x16xf32>
    %cst_6 = arith.constant dense<0.000000e+00> : vector<2x1x16xf32>
    %9 = vector.multi_reduction <add>, %4, %cst_6 [3] : vector<2x1x16x16xf32> to vector<2x1x16xf32>
    %10 = vector.shape_cast %9 : vector<2x1x16xf32> to vector<2x1x16x1xf32>
    %cst_7 = arith.constant 1.600000e+01 : f32
    %11 = vector.broadcast %cst_7 : f32 to vector<2x1x16x1xf32>
    %12 = arith.divf %10, %11 : vector<2x1x16x1xf32>
    %13 = vector.broadcast %8 : vector<2x1x1x16xf32> to vector<2x4x16x16xf32>
    %14 = arith.mulf %0, %13 : vector<2x4x16x16xf32>
    %cst_8 = arith.constant dense<0.000000e+00> : vector<2x4x16xf32>
    %15 = vector.multi_reduction <add>, %14, %cst_8 [3] : vector<2x4x16x16xf32> to vector<2x4x16xf32>
    %16 = vector.shape_cast %15 : vector<2x4x16xf32> to vector<2x4x16x1xf32>
    %cst_9 = arith.constant 6.250000e-02 : f32
    %17 = vector.broadcast %cst_9 : f32 to vector<2x4x16x1xf32>
    %18 = arith.mulf %16, %17 : vector<2x4x16x1xf32>
    %19 = vector.broadcast %12 : vector<2x1x16x1xf32> to vector<2x4x16x16xf32>
    %20 = arith.mulf %0, %19 : vector<2x4x16x16xf32>
    %cst_10 = arith.constant dense<0.000000e+00> : vector<2x4x16xf32>
    %21 = vector.multi_reduction <add>, %20, %cst_10 [2] : vector<2x4x16x16xf32> to vector<2x4x16xf32>
    %22 = vector.shape_cast %21 : vector<2x4x16xf32> to vector<2x4x1x16xf32>
    %cst_11 = arith.constant 6.250000e-02 : f32
    %23 = vector.broadcast %cst_11 : f32 to vector<2x4x1x16xf32>
    %24 = arith.mulf %22, %23 : vector<2x4x1x16xf32>
    %cst_12 = arith.constant 0.000000e+00 : f32
    %cst_13 = arith.constant 1.000000e+00 : f32
    %25 = vector.broadcast %cst_12 : f32 to vector<2x4x16x1xf32>
    %26 = arith.maximumf %25, %18 : vector<2x4x16x1xf32>
    %27 = vector.broadcast %cst_13 : f32 to vector<2x4x16x1xf32>
    %28 = arith.minimumf %27, %26 : vector<2x4x16x1xf32>
    %c0_14 = arith.constant 0 : index
    %c0_15 = arith.constant 0 : index
    %c0_16 = arith.constant 0 : index
    %c0_17 = arith.constant 0 : index
    %29 = vector.load %arg2[%c0_14, %c0_15, %c0_16, %c0_17] : memref<2x4x16x1xf32, #tpu.memory_space<vmem>>, vector<2x4x16x1xf32>
    tpu.vector_store %arg2[%c0_14, %c0_15, %c0_16, %c0_17], %28 {strides = array<i32>} : memref<2x4x16x1xf32, #tpu.memory_space<vmem>>, vector<2x4x16x1xf32>,
    %cst_18 = arith.constant 0.000000e+00 : f32
    %cst_19 = arith.constant 1.000000e+00 : f32
    %30 = vector.broadcast %cst_18 : f32 to vector<2x4x1x16xf32>
    %31 = arith.maximumf %30, %24 : vector<2x4x1x16xf32>
    %32 = vector.broadcast %cst_19 : f32 to vector<2x4x1x16xf32>
    %33 = arith.minimumf %32, %31 : vector<2x4x1x16xf32>
    %c0_20 = arith.constant 0 : index
    %c0_21 = arith.constant 0 : index
    %c0_22 = arith.constant 0 : index
    %c0_23 = arith.constant 0 : index
    %34 = vector.load %arg3[%c0_20, %c0_21, %c0_22, %c0_23] : memref<2x4x1x16xf32, #tpu.memory_space<vmem>>, vector<2x4x1x16xf32>
    tpu.vector_store %arg3[%c0_20, %c0_21, %c0_22, %c0_23], %33 {strides = array<i32>} : memref<2x4x1x16xf32, #tpu.memory_space<vmem>>, vector<2x4x1x16xf32>,
    return
  }
  func.func @transform_0(%arg0: i32) -> (i32, i32, i32, i32) {
    %c0_i32 = arith.constant 0 : i32
    %c0_i32_0 = arith.constant 0 : i32
    %c0_i32_1 = arith.constant 0 : i32
    %c0_i32_2 = arith.constant 0 : i32
    return %arg0, %c0_i32, %c0_i32_0, %c0_i32_1 : i32, i32, i32, i32
  }
  func.func @transform_1(%arg0: i32) -> (i32, i32, i32, i32) {
    %c0_i32 = arith.constant 0 : i32
    %c0_i32_0 = arith.constant 0 : i32
    %c0_i32_1 = arith.constant 0 : i32
    %c0_i32_2 = arith.constant 0 : i32
    return %arg0, %c0_i32, %c0_i32_0, %c0_i32_1 : i32, i32, i32, i32
  }
  func.func @transform_2(%arg0: i32) -> (i32, i32, i32, i32) {
    %c0_i32 = arith.constant 0 : i32
    %c0_i32_0 = arith.constant 0 : i32
    %c0_i32_1 = arith.constant 0 : i32
    %c0_i32_2 = arith.constant 0 : i32
    return %arg0, %c0_i32, %c0_i32_0, %c0_i32_1 : i32, i32, i32, i32
  }
}

</mosaic_0001>

<bundles_post_ra>
// kernel: tpu_custom_call.1
= control target key start
LH: loop header
LB: loop body
LE: loop exit
PB: predicated region body
PF: predicated region fallthrough
CT: control target
= control target key end

     0   :  { %8 = vsyncpa [#allocation3], 0  ;;  %s667_s0 = inlined_call_operand.hbm [shape: f32[2,4,16,16], index: 0, kind: input, shape index: {}]   ;;  %s668_s1 = inlined_call_operand.vmem [shape: f32[2,4,16,1], index: 1, kind: output, shape index: {0}]   ;;  %s669_s2 = inlined_call_operand.hbm [shape: f32[2,4,1,16], index: 2, kind: output, shape index: {1}]  }
   0x1   :  { %9 = vsyncpa [#allocation4], 0  ;;  %s429_s9 = smov [#allocation2]  }
   0x2   :  { %s15_s10 = sshll.u32 %s429_s9, 4  ;;  %s16_s10 = int_to_ptr.vmem [resolvable:$true] %s15_s10 }
   0x3   :  { %s393_s11 = scalar_lea.vmem %s16_s10, 2048  ;;  %p398_p1 = scmp.lt.s32.totalorder %s16_s10, %s16_s10 }
   0x4   :  { %p394_p0 = scmp.ne.s32.totalorder %s16_s10, %s393_s11  ;;  %p399_p2 = scmp.lt.s32.totalorder %s393_s11, %s393_s11 }
   0x6   :  { %p400_p3 = por %p399_p2, %p398_p1 }
   0x8   :  { %p401_p4 = pnand %p400_p3, %p394_p0 }
   0xa   :  { %404 = shalt.err (!%p401_p4)
}
   0xb   :  { %s430_s12 = smov 128   ;;  %s431_s13 = smov 8  }
   0xc   :  { %21 = dma.hbm_to_vmem [thread:$0]  %s667_s0, 2048, %s16_s10, [#allocation3], %s430_s12, %s430_s12, %s431_s13  }
   0xd   :  { %425 = dma.done.wait [#allocation3], 2048  }
   0xe   :  { %426 = vsyncadd [#allocation3], 4294965248  ;;  %vm41_vm0 = vcmask 130048   ;;  %v453_v0 = vld [vmem:[#allocation2 + $0x40] sm:$0xff]  ;;  %v455_v1 = vld [vmem:[#allocation2 + $0x50] sm:$0xff]  ;;  %vm349_vm1 = vcmask 122880  }
   0xf   :  { %v457_v2 = vld [vmem:[#allocation2 + $0x60] sm:$0xff]  ;;  %v459_v3 = vld [vmem:[#allocation2 + $0x70] sm:$0xff]  ;;  %v56_v4 = vsel %vm41_vm0, %v453_v0, 0.0  ;;  %v57_v5 = vsel %vm41_vm0, %v455_v1, 0.0  ;;  %v479_v14 = vld [vmem:[#allocation2 + $0x48] sm:$0xff]  ;;  %s432_s0 = smov [#allocation5]  }
  0x10   :  { %v59_v6 = vsel %vm41_vm0, %v457_v2, 0.0  ;;  %v467_v7 = vld [vmem:[#allocation2] sm:$0xff]  ;;  %v469_v8 = vld [vmem:[#allocation2 + $0x10] sm:$0xff]  ;;  %v58_v9 = vadd.f32 %v57_v5, %v56_v4  ;;  %v61_v15 = vsel %vm41_vm0, %v459_v3, 0.0  ;;  %v485_v18 = vld [vmem:[#allocation2 + $0x58] sm:$0xff]  ;;  %v63_v21 = vsel %vm41_vm0, %v479_v14, 0.0 }
  0x11   :  { %v471_v10 = vld [vmem:[#allocation2 + $0x20] sm:$0xff]  ;;  %v473_v11 = vld [vmem:[#allocation2 + $0x30] sm:$0xff]  ;;  %v42_v12 = vsel %vm41_vm0, %v467_v7, 0.0  ;;  %v43_v13 = vsel %vm41_vm0, %v469_v8, 0.0  ;;  %v487_v19 = vld [vmem:[#allocation2 + $0x68] sm:$0xff]  ;;  %v64_v24 = vsel %vm41_vm0, %v485_v18, 0.0 }
  0x12   :  { %v44_v16 = vadd.f32 %v43_v13, %v42_v12  ;;  %v45_v17 = vsel %vm41_vm0, %v471_v10, 0.0  ;;  %v489_v20 = vld [vmem:[#allocation2 + $0x78] sm:$0xff]  ;;  %v60_v22 = vadd.f32 %v59_v6, %v58_v9  ;;  %v47_v23 = vsel %vm41_vm0, %v473_v11, 0.0  ;;  %v499_v26 = vld [vmem:[#allocation2 + $0x8] sm:$0xff]  ;;  %s365_s16 = sshll.u32 %s432_s0, 4  ;;  %s589_s16 = int_to_ptr.vmem [resolvable:$true] %s365_s16 }
  0x13   :  { %v66_v25 = vsel %vm41_vm0, %v487_v19, 0.0  ;;  %v501_v27 = vld [vmem:[#allocation2 + $0x18] sm:$0xff]  ;;  %v503_v28 = vld [vmem:[#allocation2 + $0x28] sm:$0xff]  ;;  %v65_v30 = vadd.f32 %v64_v24, %v63_v21  ;;  %v49_v32 = vsel %vm41_vm0, %v499_v26, 0.0  ;;  %v68_v35 = vsel %vm41_vm0, %v489_v20, 0.0  ;;  %s405_s17 = scalar_lea.vmem %s589_s16, 128  ;;  %p410_p6 = scmp.lt.s32.totalorder %s589_s16, %s589_s16 }
  0x14   :  { %v46_v29 = vadd.f32 %v45_v17, %v44_v16  ;;  %v505_v31 = vld [vmem:[#allocation2 + $0x38] sm:$0xff]  ;;  %v50_v33 = vsel %vm41_vm0, %v501_v27, 0.0  ;;  %v62_v34 = vadd.f32 %v61_v15, %v60_v22  ;;  %v52_v37 = vsel %vm41_vm0, %v503_v28, 0.0  ;;  %p406_p5 = scmp.ne.s32.totalorder %s589_s16, %s405_s17  ;;  %p411_p7 = scmp.lt.s32.totalorder %s405_s17, %s405_s17 }
  0x15   :  { %v51_v36 = vadd.f32 %v50_v33, %v49_v32  ;;  %v67_v39 = vadd.f32 %v66_v25, %v65_v30  ;;  %v54_v40 = vsel %vm41_vm0, %v505_v31, 0.0  ;;  %vm316_vm2 = vcmask 7168  }
  0x16   :  { %v48_v38 = vadd.f32 %v47_v23, %v46_v29  ;;  %v73_v41 = vmul.f32 0.25, %v62_v34  ;;  %p412_p8 = por %p411_p7, %p410_p6 }
  0x17   :  { %v53_v42 = vadd.f32 %v52_v37, %v51_v36  ;;  %v69_v44 = vadd.f32 %v68_v35, %v67_v39 }
  0x18   :  { %v71_v43 = vmul.f32 0.25, %v48_v38  ;;  %v84_v45 = vsel %vm41_vm0, %v73_v41, 0.0  ;;  %p413_p9 = pnand %p412_p8, %p406_p5 }
  0x19   :  { %v55_v46 = vadd.f32 %v54_v40, %v53_v42  ;;  %100 = vadd.xlane.f32.xlu1 %v84_v45  ;;  %v74_v48 = vmul.f32 0.25, %v69_v44 }
  0x1a   :  { %v75_v47 = vsel %vm41_vm0, %v71_v43, 0.0 }
  0x1b   :  { %96 = vadd.xlane.f32.xlu0 %v75_v47  ;;  %v72_v49 = vmul.f32 0.25, %v55_v46  ;;  %v85_v50 = vsel %vm41_vm0, %v74_v48, 0.0 }
  0x1c   :  { %v86_v51 = vadd.f32 %v85_v50, %v84_v45 }
  0x1d   :  { %v76_v52 = vsel %vm41_vm0, %v72_v49, 0.0  ;;  %102 = vadd.xlane.f32.xlu1 %v85_v50 }
  0x1e   :  { %v77_v53 = vadd.f32 %v76_v52, %v75_v47  ;;  %v87_v54 = vrot.slane %v86_v51, 4 }
  0x1f   :  { %98 = vadd.xlane.f32.xlu0 %v76_v52 }
  0x20   :  { %v78_v55 = vrot.slane %v77_v53, 4  ;;  %v88_v56 = vadd.f32 %v87_v54, %v86_v51 }
  0x22   :  { %v79_v57 = vadd.f32 %v78_v55, %v77_v53  ;;  %v89_v59 = vrot.slane %v88_v56, 2 }
  0x24   :  { %v80_v58 = vrot.slane %v79_v57, 2  ;;  %v90_v62 = vadd.f32 %v89_v59, %v88_v56 }
  0x26   :  { %v81_v60 = vadd.f32 %v80_v58, %v79_v57  ;;  %v91_v5 = vrot.slane %v90_v62, 1 }
  0x28   :  { %v82_v61 = vrot.slane %v81_v60, 1  ;;  %v92_v17 = vadd.f32 %v91_v5, %v90_v62 }
  0x2a   :  { %v83_v63 = vadd.f32 %v82_v61, %v81_v60  ;;  %v95_v25 = vmul.f32 0.0625, %v92_v17 }
  0x2c   :  { %v94_v4 = vmul.f32 0.0625, %v83_v63  ;;  %v117_v36 = vmul.f32 %v95_v25, %v479_v14  ;;  %v116_v37 = vmul.f32 %v95_v25, %v453_v0  ;;  %v119_v40 = vmul.f32 %v95_v25, %v485_v18 }
  0x2d   :  { %v118_v41 = vmul.f32 %v95_v25, %v455_v1  ;;  %v121_v44 = vmul.f32 %v95_v25, %v487_v19  ;;  %v120_v45 = vmul.f32 %v95_v25, %v457_v2  ;;  %v123_v48 = vmul.f32 %v95_v25, %v489_v20 }
  0x2e   :  { %v109_v6 = vmul.f32 %v94_v4, %v499_v26  ;;  %v108_v9 = vmul.f32 %v94_v4, %v467_v7  ;;  %v111_v12 = vmul.f32 %v94_v4, %v501_v27  ;;  %v110_v13 = vmul.f32 %v94_v4, %v469_v8 }
  0x2f   :  { %v113_v23 = vmul.f32 %v94_v4, %v503_v28  ;;  %v112_v24 = vmul.f32 %v94_v4, %v471_v10  ;;  %v115_v32 = vmul.f32 %v94_v4, %v505_v31  ;;  %v114_v33 = vmul.f32 %v94_v4, %v473_v11 }
  0x30   :  { %v127_v15 = vsel %vm41_vm0, %v109_v6, 0.0  ;;  %v124_v16 = vsel %vm41_vm0, %v108_v9, 0.0  ;;  %v133_v21 = vsel %vm41_vm0, %v111_v12, 0.0  ;;  %v130_v22 = vsel %vm41_vm0, %v110_v13, 0.0 }
  0x31   :  { %128 = vadd.xlane.f32.xlu1 %v127_v15  ;;  %125 = vadd.xlane.f32.xlu0 %v124_v16  ;;  %v139_v29 = vsel %vm41_vm0, %v113_v23, 0.0  ;;  %v136_v30 = vsel %vm41_vm0, %v112_v24, 0.0  ;;  %v145_v34 = vsel %vm41_vm0, %v115_v32, 0.0  ;;  %v142_v35 = vsel %vm41_vm0, %v114_v33, 0.0 }
  0x32   :  { %v151_v38 = vsel %vm41_vm0, %v117_v36, 0.0  ;;  %v148_v39 = vsel %vm41_vm0, %v116_v37, 0.0  ;;  %v157_v42 = vsel %vm41_vm0, %v119_v40, 0.0  ;;  %v154_v43 = vsel %vm41_vm0, %v118_v41, 0.0 }
  0x33   :  { %v163_v46 = vsel %vm41_vm0, %v121_v44, 0.0  ;;  %v160_v47 = vsel %vm41_vm0, %v120_v45, 0.0  ;;  %v122_v49 = vmul.f32 %v95_v25, %v459_v3  ;;  %v169_v50 = vsel %vm41_vm0, %v123_v48, 0.0 }
  0x35   :  { %134 = vadd.xlane.f32.xlu1 %v133_v21  ;;  %131 = vadd.xlane.f32.xlu0 %v130_v22  ;;  %v166_v51 = vsel %vm41_vm0, %v122_v49, 0.0 }
  0x39   :  { %140 = vadd.xlane.f32.xlu1 %v139_v29  ;;  %137 = vadd.xlane.f32.xlu0 %v136_v30 }
  0x3d   :  { %146 = vadd.xlane.f32.xlu1 %v145_v34  ;;  %143 = vadd.xlane.f32.xlu0 %v142_v35 }
  0x41   :  { %152 = vadd.xlane.f32.xlu1 %v151_v38  ;;  %149 = vadd.xlane.f32.xlu0 %v148_v39 }
  0x45   :  { %158 = vadd.xlane.f32.xlu1 %v157_v42  ;;  %155 = vadd.xlane.f32.xlu0 %v154_v43 }
  0x49   :  { %164 = vadd.xlane.f32.xlu1 %v163_v46  ;;  %161 = vadd.xlane.f32.xlu0 %v160_v47 }
  0x4d   :  { %170 = vadd.xlane.f32.xlu1 %v169_v50  ;;  %167 = vadd.xlane.f32.xlu0 %v166_v51 }
  0xa2   :  { %v101_v52 = vpop.xlane.xlu1 %100 }
  0xa3   :  { %v106_v53 = vmul.f32 0.0625, %v101_v52 }
  0xa4   :  { %v97_v54 = vpop.xlane.xlu0 %96 }
  0xa5   :  { %v104_v55 = vmul.f32 0.0625, %v97_v54  ;;  %v196_v56 = vmul.f32 %v106_v53, %v453_v0  ;;  %v198_v57 = vmul.f32 %v106_v53, %v455_v1  ;;  %v200_v58 = vmul.f32 %v106_v53, %v457_v2 }
  0xa6   :  { %v202_v59 = vmul.f32 %v106_v53, %v459_v3  ;;  %v103_v4 = vpop.xlane.xlu1 %102 }
  0xa7   :  { %v188_v60 = vmul.f32 %v104_v55, %v467_v7  ;;  %v190_v61 = vmul.f32 %v104_v55, %v469_v8  ;;  %v192_v62 = vmul.f32 %v104_v55, %v471_v10  ;;  %v194_v63 = vmul.f32 %v104_v55, %v473_v11 }
  0xa8   :  { %v99_v5 = vpop.xlane.xlu0 %98  ;;  %v240_v6 = vsel %vm41_vm0, %v196_v56, 0.0  ;;  %v249_v0 = vsel %vm41_vm0, %v198_v57, 0.0  ;;  %v258_v1 = vsel %vm41_vm0, %v200_v58, 0.0  ;;  %v267_v2 = vsel %vm41_vm0, %v202_v59, 0.0 }
  0xa9   :  { %v107_v9 = vmul.f32 0.0625, %v103_v4  ;;  %v105_v3 = vmul.f32 0.0625, %v99_v5  ;;  %v204_v7 = vsel %vm41_vm0, %v188_v60, 0.0  ;;  %v213_v8 = vsel %vm41_vm0, %v190_v61, 0.0 }
  0xaa   :  { %v222_v10 = vsel %vm41_vm0, %v192_v62, 0.0  ;;  %v231_v11 = vsel %vm41_vm0, %v194_v63, 0.0 }
  0xab   :  { %v197_v12 = vmul.f32 %v107_v9, %v479_v14  ;;  %v199_v13 = vmul.f32 %v107_v9, %v485_v18  ;;  %v201_v15 = vmul.f32 %v107_v9, %v487_v19  ;;  %v203_v16 = vmul.f32 %v107_v9, %v489_v20 }
  0xac   :  { %v189_v17 = vmul.f32 %v105_v3, %v499_v26  ;;  %v191_v21 = vmul.f32 %v105_v3, %v501_v27  ;;  %v193_v22 = vmul.f32 %v105_v3, %v503_v28  ;;  %v195_v23 = vmul.f32 %v105_v3, %v505_v31 }
  0xad   :  { %v241_v24 = vsel %vm41_vm0, %v197_v12, 0.0  ;;  %v250_v25 = vsel %vm41_vm0, %v199_v13, 0.0  ;;  %v259_v14 = vsel %vm41_vm0, %v201_v15, 0.0  ;;  %v268_v18 = vsel %vm41_vm0, %v203_v16, 0.0 }
  0xae   :  { %v242_v29 = vadd.f32 %v241_v24, %v240_v6  ;;  %v251_v19 = vadd.f32 %v250_v25, %v249_v0  ;;  %v260_v30 = vadd.f32 %v259_v14, %v258_v1  ;;  %v269_v20 = vadd.f32 %v268_v18, %v267_v2 }
  0xaf   :  { %v205_v26 = vsel %vm41_vm0, %v189_v17, 0.0  ;;  %v214_v27 = vsel %vm41_vm0, %v191_v21, 0.0  ;;  %v223_v28 = vsel %vm41_vm0, %v193_v22, 0.0  ;;  %v232_v31 = vsel %vm41_vm0, %v195_v23, 0.0 }
  0xb0   :  { %v243_v32 = vrot.slane %v242_v29, 4  ;;  %v252_v33 = vrot.slane %v251_v19, 4  ;;  %v261_v34 = vrot.slane %v260_v30, 4  ;;  %v270_v35 = vrot.slane %v269_v20, 4 }
  0xb1   :  { %v206_v36 = vadd.f32 %v205_v26, %v204_v7  ;;  %v215_v37 = vadd.f32 %v214_v27, %v213_v8  ;;  %v224_v38 = vadd.f32 %v223_v28, %v222_v10  ;;  %v233_v39 = vadd.f32 %v232_v31, %v231_v11 }
  0xb2   :  { %v244_v40 = vadd.f32 %v243_v32, %v242_v29  ;;  %v253_v41 = vadd.f32 %v252_v33, %v251_v19  ;;  %v262_v42 = vadd.f32 %v261_v34, %v260_v30  ;;  %v271_v43 = vadd.f32 %v270_v35, %v269_v20 }
  0xb3   :  { %v207_v44 = vrot.slane %v206_v36, 4  ;;  %v216_v45 = vrot.slane %v215_v37, 4  ;;  %v225_v46 = vrot.slane %v224_v38, 4  ;;  %v234_v47 = vrot.slane %v233_v39, 4 }
  0xb4   :  { %v245_v48 = vrot.slane %v244_v40, 2  ;;  %v254_v49 = vrot.slane %v253_v41, 2  ;;  %v263_v50 = vrot.slane %v262_v42, 2  ;;  %v272_v51 = vrot.slane %v271_v43, 2 }
  0xb5   :  { %v208_v52 = vadd.f32 %v207_v44, %v206_v36  ;;  %v217_v53 = vadd.f32 %v216_v45, %v215_v37  ;;  %v226_v54 = vadd.f32 %v225_v46, %v224_v38  ;;  %v235_v55 = vadd.f32 %v234_v47, %v233_v39 }
  0xb6   :  { %v246_v56 = vadd.f32 %v245_v48, %v244_v40  ;;  %v255_v57 = vadd.f32 %v254_v49, %v253_v41  ;;  %v264_v58 = vadd.f32 %v263_v50, %v262_v42  ;;  %v273_v59 = vadd.f32 %v272_v51, %v271_v43 }
  0xb7   :  { %v209_v60 = vrot.slane %v208_v52, 2  ;;  %v218_v61 = vrot.slane %v217_v53, 2  ;;  %v227_v62 = vrot.slane %v226_v54, 2  ;;  %v236_v63 = vrot.slane %v235_v55, 2 }
  0xb8   :  { %v247_v4 = vrot.slane %v246_v56, 1  ;;  %v256_v5 = vrot.slane %v255_v57, 1  ;;  %v265_v6 = vrot.slane %v264_v58, 1  ;;  %v274_v0 = vrot.slane %v273_v59, 1 }
  0xb9   :  { %v210_v1 = vadd.f32 %v209_v60, %v208_v52  ;;  %v219_v2 = vadd.f32 %v218_v61, %v217_v53  ;;  %v228_v9 = vadd.f32 %v227_v62, %v226_v54  ;;  %v237_v3 = vadd.f32 %v236_v63, %v235_v55 }
  0xba   :  { %v129_v7 = vpop.xlane.xlu1 %128  ;;  %v126_v8 = vpop.xlane.xlu0 %125  ;;  %v248_v10 = vadd.f32 %v247_v4, %v246_v56  ;;  %v257_v11 = vadd.f32 %v256_v5, %v255_v57  ;;  %v266_v12 = vadd.f32 %v265_v6, %v264_v58  ;;  %v275_v13 = vadd.f32 %v274_v0, %v273_v59 }
  0xbb   :  { %v211_v15 = vrot.slane %v210_v1, 1  ;;  %v220_v16 = vrot.slane %v219_v2, 1  ;;  %v229_v17 = vrot.slane %v228_v9, 1  ;;  %v238_v21 = vrot.slane %v237_v3, 1 }
  0xbc   :  { %v280_v22 = vmul.f32 0.0625, %v248_v10  ;;  %v281_v23 = vmul.f32 0.0625, %v257_v11  ;;  %v282_v24 = vmul.f32 0.0625, %v266_v12  ;;  %v283_v25 = vmul.f32 0.0625, %v275_v13 }
  0xbd   :  { %v212_v14 = vadd.f32 %v211_v15, %v210_v1  ;;  %v221_v18 = vadd.f32 %v220_v16, %v219_v2  ;;  %v230_v29 = vadd.f32 %v229_v17, %v228_v9  ;;  %v239_v19 = vadd.f32 %v238_v21, %v237_v3 }
  0xbe   :  { %v135_v30 = vpop.xlane.xlu1 %134  ;;  %v132_v20 = vpop.xlane.xlu0 %131  ;;  %v337_v26 = vmax.f32 %v280_v22, 0.0  ;;  %v338_v27 = vmax.f32 %v281_v23, 0.0  ;;  %v339_v28 = vmax.f32 %v282_v24, 0.0  ;;  %v340_v31 = vmax.f32 %v283_v25, 0.0 }
  0xbf   :  { %v276_v32 = vmul.f32 0.0625, %v212_v14  ;;  %v277_v33 = vmul.f32 0.0625, %v221_v18  ;;  %v278_v34 = vmul.f32 0.0625, %v230_v29  ;;  %v279_v35 = vmul.f32 0.0625, %v239_v19 }
  0xc0   :  { %v345_v36 = vmin.f32 %v337_v26, 1.0  ;;  %v346_v37 = vmin.f32 %v338_v27, 1.0  ;;  %v347_v38 = vmin.f32 %v339_v28, 1.0  ;;  %v348_v39 = vmin.f32 %v340_v31, 1.0 }
  0xc1   :  { %v333_v40 = vmax.f32 %v276_v32, 0.0  ;;  %v334_v41 = vmax.f32 %v277_v33, 0.0  ;;  %v335_v42 = vmax.f32 %v278_v34, 0.0  ;;  %v336_v43 = vmax.f32 %v279_v35, 0.0 }
  0xc2   :  { %v141_v44 = vpop.xlane.xlu1 %140  ;;  %v138_v45 = vpop.xlane.xlu0 %137  ;;  %354 = vst.msk [vmem:[#allocation5 + $0x4] sm:$0x1] %vm349_vm1, %v345_v36  ;;  %355 = vst.msk [vmem:[#allocation5 + $0x5] sm:$0x1] %vm349_vm1, %v346_v37  ;;  %v173_v46 = vmul.f32 0.0625, %v129_v7  ;;  %v172_v47 = vmul.f32 0.0625, %v126_v8 }
  0xc3   :  { %356 = vst.msk [vmem:[#allocation5 + $0x6] sm:$0x1] %vm349_vm1, %v347_v38  ;;  %357 = vst.msk [vmem:[#allocation5 + $0x7] sm:$0x1] %vm349_vm1, %v348_v39  ;;  %v175_v48 = vmul.f32 0.0625, %v135_v30  ;;  %v174_v49 = vmul.f32 0.0625, %v132_v20 }
  0xc4   :  { %v341_v50 = vmin.f32 %v333_v40, 1.0  ;;  %v342_v51 = vmin.f32 %v334_v41, 1.0  ;;  %v343_v52 = vmin.f32 %v335_v42, 1.0  ;;  %v344_v53 = vmin.f32 %v336_v43, 1.0 }
  0xc5   :  { %v285_v54 = vmax.f32 %v173_v46, 0.0  ;;  %v284_v55 = vmax.f32 %v172_v47, 0.0  ;;  %v287_v56 = vmax.f32 %v175_v48, 0.0  ;;  %v286_v57 = vmax.f32 %v174_v49, 0.0 }
  0xc6   :  { %350 = vst.msk [vmem:[#allocation5] sm:$0x1] %vm349_vm1, %v341_v50  ;;  %351 = vst.msk [vmem:[#allocation5 + $0x1] sm:$0x1] %vm349_vm1, %v342_v51  ;;  %v177_v58 = vmul.f32 0.0625, %v141_v44  ;;  %v176_v59 = vmul.f32 0.0625, %v138_v45  ;;  %v147_v60 = vpop.xlane.xlu1 %146  ;;  %v144_v61 = vpop.xlane.xlu0 %143 }
  0xc7   :  { %352 = vst.msk [vmem:[#allocation5 + $0x2] sm:$0x1] %vm349_vm1, %v343_v52  ;;  %353 = vst.msk [vmem:[#allocation5 + $0x3] sm:$0x1] %vm349_vm1, %v344_v53  ;;  %v301_v62 = vmin.f32 %v285_v54, 1.0  ;;  %v300_v63 = vmin.f32 %v284_v55, 1.0 }
  0xc8   :  { %v303_v4 = vmin.f32 %v287_v56, 1.0  ;;  %v302_v5 = vmin.f32 %v286_v57, 1.0 }
  0xc9   :  { %416 = shalt.err (!%p413_p9)
}
  0xca   :  { %s433_s18 = smov 16   ;;  %s434_s19 = smov 1   ;;  %v289_v6 = vmax.f32 %v177_v58, 0.0  ;;  %v288_v0 = vmax.f32 %v176_v59, 0.0  ;;  %v179_v1 = vmul.f32 0.0625, %v147_v60  ;;  %v178_v2 = vmul.f32 0.0625, %v144_v61  ;;  %v153_v10 = vpop.xlane.xlu1 %152  ;;  %v150_v11 = vpop.xlane.xlu0 %149 }
  0xcb   :  { %371 = dma.vmem_to_hbm [thread:$0]  %s589_s16, 128, %s669_s2, [#allocation4], %s433_s18, %s433_s18, %s434_s19   ;;  %v181_v12 = vmul.f32 0.0625, %v153_v10  ;;  %v180_v13 = vmul.f32 0.0625, %v150_v11 }
  0xcc   :  { %318 = vst.msk [vmem:[%s668_s1 + $0x8] sm:$0xff] %vm316_vm2, %v301_v62  ;;  %317 = vst.msk [vmem:[%s668_s1] sm:$0xff] %vm316_vm2, %v300_v63  ;;  %v305_v9 = vmin.f32 %v289_v6, 1.0  ;;  %v304_v3 = vmin.f32 %v288_v0, 1.0  ;;  %v291_v7 = vmax.f32 %v179_v1, 0.0  ;;  %v290_v8 = vmax.f32 %v178_v2, 0.0 }
  0xcd   :  { %320 = vst.msk [vmem:[%s668_s1 + $0x18] sm:$0xff] %vm316_vm2, %v303_v4  ;;  %319 = vst.msk [vmem:[%s668_s1 + $0x10] sm:$0xff] %vm316_vm2, %v302_v5  ;;  %v293_v17 = vmax.f32 %v181_v12, 0.0  ;;  %v292_v21 = vmax.f32 %v180_v13, 0.0 }
  0xce   :  { %322 = vst.msk [vmem:[%s668_s1 + $0x28] sm:$0xff] %vm316_vm2, %v305_v9  ;;  %321 = vst.msk [vmem:[%s668_s1 + $0x20] sm:$0xff] %vm316_vm2, %v304_v3  ;;  %v307_v15 = vmin.f32 %v291_v7, 1.0  ;;  %v306_v16 = vmin.f32 %v290_v8, 1.0  ;;  %v159_v22 = vpop.xlane.xlu1 %158  ;;  %v156_v23 = vpop.xlane.xlu0 %155 }
  0xcf   :  { %v309_v24 = vmin.f32 %v293_v17, 1.0  ;;  %v308_v25 = vmin.f32 %v292_v21, 1.0  ;;  %v183_v14 = vmul.f32 0.0625, %v159_v22  ;;  %v182_v18 = vmul.f32 0.0625, %v156_v23 }
  0xd0   :  { %324 = vst.msk [vmem:[%s668_s1 + $0x38] sm:$0xff] %vm316_vm2, %v307_v15  ;;  %323 = vst.msk [vmem:[%s668_s1 + $0x30] sm:$0xff] %vm316_vm2, %v306_v16 }
  0xd1   :  { %326 = vst.msk [vmem:[%s668_s1 + $0x48] sm:$0xff] %vm316_vm2, %v309_v24  ;;  %325 = vst.msk [vmem:[%s668_s1 + $0x40] sm:$0xff] %vm316_vm2, %v308_v25  ;;  %v295_v29 = vmax.f32 %v183_v14, 0.0  ;;  %v294_v19 = vmax.f32 %v182_v18, 0.0 }
  0xd2   :  { %v165_v30 = vpop.xlane.xlu1 %164  ;;  %v162_v20 = vpop.xlane.xlu0 %161 }
  0xd3   :  { %v311_v26 = vmin.f32 %v295_v29, 1.0  ;;  %v310_v27 = vmin.f32 %v294_v19, 1.0  ;;  %v185_v28 = vmul.f32 0.0625, %v165_v30  ;;  %v184_v31 = vmul.f32 0.0625, %v162_v20 }
  0xd5   :  { %328 = vst.msk [vmem:[%s668_s1 + $0x58] sm:$0xff] %vm316_vm2, %v311_v26  ;;  %327 = vst.msk [vmem:[%s668_s1 + $0x50] sm:$0xff] %vm316_vm2, %v310_v27  ;;  %v297_v32 = vmax.f32 %v185_v28, 0.0  ;;  %v296_v33 = vmax.f32 %v184_v31, 0.0 }
  0xd6   :  { %v171_v34 = vpop.xlane.xlu1 %170  ;;  %v168_v35 = vpop.xlane.xlu0 %167 }
  0xd7   :  { %v313_v36 = vmin.f32 %v297_v32, 1.0  ;;  %v312_v37 = vmin.f32 %v296_v33, 1.0  ;;  %v187_v38 = vmul.f32 0.0625, %v171_v34  ;;  %v186_v39 = vmul.f32 0.0625, %v168_v35 }
  0xd9   :  { %330 = vst.msk [vmem:[%s668_s1 + $0x68] sm:$0xff] %vm316_vm2, %v313_v36  ;;  %329 = vst.msk [vmem:[%s668_s1 + $0x60] sm:$0xff] %vm316_vm2, %v312_v37  ;;  %v299_v40 = vmax.f32 %v187_v38, 0.0  ;;  %v298_v41 = vmax.f32 %v186_v39, 0.0 }
  0xdb   :  { %v315_v42 = vmin.f32 %v299_v40, 1.0  ;;  %v314_v43 = vmin.f32 %v298_v41, 1.0 }
  0xdd   :  { %332 = vst.msk [vmem:[%s668_s1 + $0x78] sm:$0xff] %vm316_vm2, %v315_v42  ;;  %331 = vst.msk [vmem:[%s668_s1 + $0x70] sm:$0xff] %vm316_vm2, %v314_v43 }
  0xde   :  { %427 = dma.done.wait [#allocation4], 128  }
  0xdf   :  { %428 = vsyncadd [#allocation4], 4294967168 }
  0xe0   :  { %377 = vsyncpa [#allocation3], 1 }
  0xe1   :  { %378 = vsyncpa [#allocation4], 1 }

</bundles_post_ra>
